<compile_context>
chip_gen: v7x
topology: tpu7x:2x2x1
jax: 0.10.0
libtpu: 0.0.40
codegen_flags: <defaults>
</compile_context>

<pallas_src>
import functools

import jax
import jax.numpy as jnp
from jax.experimental import pallas as pl
from jax.experimental.pallas import tpu as pltpu

_HEADROOM = 8 << 20  # compiler scratch / pipeline slack


def _round_up(x, m):
    return ((x + m - 1) // m) * m


def _cdiv(a, b):
    return -(-a // b)


def _device_kind():
    try:
        return jax.devices()[0].device_kind.lower()
    except Exception:
        return ""


def _vmem_capacity_bytes():
    try:
        cap = int(getattr(pltpu.get_tpu_info(), "vmem_capacity_bytes", 0))
        if cap > 0:
            return cap
    except Exception:
        pass
    return (64 << 20) if "v7" in _device_kind() else (128 << 20)


def _supports_bf16_eup():
    kind = _device_kind()
    return ("v6" in kind) or ("v7" in kind)


def _footprint_bytes(tm, tn, d, in_size, out_size):
    # Double-buffered z row tile + Y column tile + output tile.
    return 2 * (tm * d * in_size + d * tn * in_size + tm * tn * out_size)


def _select_tiles(n, d, in_size, out_size, row_mult, tm_pref, tn_pref, budget):
    """Pick (tm, tn) output tile sizes that fit the per-generation VMEM budget."""
    tm = min(tm_pref, _round_up(n, row_mult))
    if tm > n:
        tm = n  # full row extent: always a legal block dim
    # Keep >= 2 row blocks when the problem allows it (v7x megacore sharding;
    # on single-TC v5e/v6e the extra grid step costs ~0.35us, i.e. nothing).
    if _cdiv(n, tm) < 2 and n >= 2 * row_mult:
        tm = max(row_mult, _round_up(_cdiv(n, 2), row_mult))

    # Fully-resident Y (column grid of 1): Y is never re-streamed and every
    # writeback is a full contiguous row panel.
    if _footprint_bytes(tm, n, d, in_size, out_size) + _HEADROOM <= budget:
        return tm, n

    tn = min(tn_pref, _round_up(n, 128))
    if tn > n:
        tn = n
    while tn > 128 and (_footprint_bytes(tm, tn, d, in_size, out_size)
                        + _HEADROOM > budget):
        tn = max(128, _round_up(tn // 2, 128))
    while tm > row_mult and (_footprint_bytes(tm, tn, d, in_size, out_size)
                             + _HEADROOM > budget):
        tm = max(row_mult, _round_up(tm // 2, row_mult))
    return tm, tn


def _bilinear_decoder_kernel(z_ref, y_ref, adj_ref, *, act_dtype):
    """One (tm, tn) output tile: adj = sigmoid(z_tile @ y_tile).

    z_ref   : (tm, D)  row tile of z
    y_ref   : (D, tn)  column tile of Y = W @ z^T
    adj_ref : (tm, tn) output tile
    """
    s = jnp.dot(z_ref[...], y_ref[...], preferred_element_type=jnp.float32)
    s = s.astype(act_dtype)
    half = jnp.asarray(0.5, dtype=act_dtype)
    # sigmoid(x) == 0.5 * tanh(0.5 * x) + 0.5  -> a single EUP push per element.
    adj_ref[...] = (half * jnp.tanh(half * s) + half).astype(adj_ref.dtype)


@functools.partial(jax.jit, static_argnames=("tm", "tn", "out_dtype"))
def bilinear_decoder(z, weight, *, tm=512, tn=None, out_dtype=jnp.bfloat16):
    """adj = sigmoid(z @ weight @ z.T), eval-mode dropout (identity).

    z        : [N, D]
    weight   : [D, D]
    out_dtype: defaults to bfloat16 (halves the N^2 writeback); pass
               jnp.float32 for exact PyTorch parity.
    """
    n, d = z.shape
    assert weight.shape == (d, d)
    out_dtype = jnp.dtype(out_dtype)
    in_dtype = z.dtype

    # TODO(synk): training-mode dropout (inverted dropout via pltpu.prng_*)
    # omitted; PyTorch forward with training=False is the identity we match.

    # Hoist the cheap bilinear projection out of the grid: Y = W @ z^T -> [D, N].
    y = jnp.dot(weight.astype(in_dtype), z.T,
                preferred_element_type=jnp.float32).astype(in_dtype)

    in_size = jnp.dtype(in_dtype).itemsize
    out_size = out_dtype.itemsize
    # Sub-32-bit outputs pack along sublanes: 16-row multiples for bf16
    # (32 for 8-bit) keep the writeback path unmasked.
    row_mult = 8 if out_size >= 4 else (16 if out_size == 2 else 32)

    vmem_cap = _vmem_capacity_bytes()
    budget = (vmem_cap * 7) // 10  # ~45 MiB on v7x, ~90 MiB on v5e/v6e
    tn_pref = tn if tn is not None else (4096 if vmem_cap <= (64 << 20) else 8192)

    tm_eff, tn_eff = _select_tiles(n, d, in_size, out_size, row_mult,
                                   tm, tn_pref, budget)
    grid = (_cdiv(n, tm_eff), _cdiv(n, tn_eff))

    footprint = _footprint_bytes(tm_eff, tn_eff, d, in_size, out_size)
    vmem_limit = int(min(vmem_cap, max(footprint + (16 << 20), 32 << 20)))

    # bf16 activation only on chips with a bf16 VPU/EUP path (v6e / v7x).
    act_dtype = (jnp.bfloat16
                 if out_dtype == jnp.bfloat16 and _supports_bf16_eup()
                 else jnp.float32)

    # Truthful advisory cost: z once, Y re-read per row block (once if resident),
    # plus the N^2 writeback.
    y_reads = n * d if grid[1] == 1 else grid[0] * n * d
    cost = pl.CostEstimate(
        flops=2 * n * n * d,
        transcendentals=n * n,
        bytes_accessed=int(n * d * in_size + y_reads * in_size
                           + n * n * out_size),
    )

    kernel = functools.partial(_bilinear_decoder_kernel, act_dtype=act_dtype)

    return pl.pallas_call(
        kernel,
        out_shape=jax.ShapeDtypeStruct((n, n), out_dtype),
        grid_spec=pltpu.PrefetchScalarGridSpec(
            num_scalar_prefetch=0,
            grid=grid,
            in_specs=[
                # row tile of z (marches down the output rows)
                pl.BlockSpec((tm_eff, d), lambda i, j: (i, 0)),
                # column tile of Y = W @ z^T (marches across the output cols)
                pl.BlockSpec((d, tn_eff), lambda i, j: (0, j)),
            ],
            out_specs=pl.BlockSpec((tm_eff, tn_eff), lambda i, j: (i, j)),
        ),
        compiler_params=pltpu.CompilerParams(
            dimension_semantics=("parallel", "parallel"),
            vmem_limit_bytes=vmem_limit,
        ),
        cost_estimate=cost,
    )(z, y)


def xavier_uniform(key, shape, dtype=jnp.float32):
    fan_in, fan_out = shape[0], shape[1]
    bound = (6.0 / (fan_in + fan_out)) ** 0.5
    return jax.random.uniform(key, shape, dtype, minval=-bound, maxval=bound)


if __name__ == "__main__":
    key = jax.random.PRNGKey(0)
    k_z, k_w = jax.random.split(key)

    N, D = 128, 32  # small: 128 nodes, 32-dim latent embeddings
    z = jax.random.normal(k_z, (N, D), dtype=jnp.float32)
    weight = xavier_uniform(k_w, (D, D))

    ref = jax.nn.sigmoid(z @ (weight @ z.T))

    # Default path: bf16 output (halved HBM writeback).
    adj_bf16 = jax.block_until_ready(bilinear_decoder(z, weight))
    assert adj_bf16.shape == (N, N) and adj_bf16.dtype == jnp.bfloat16
    assert jnp.allclose(adj_bf16.astype(jnp.float32), ref, atol=1e-2), \
        "bf16 mismatch vs reference"

    # f32 output path: exact PyTorch parity.
    adj_f32 = jax.block_until_ready(
        bilinear_decoder(z, weight, out_dtype=jnp.float32))
    assert adj_f32.shape == (N, N) and adj_f32.dtype == jnp.float32
    assert jnp.allclose(adj_f32, ref, atol=1e-4, rtol=1e-4), \
        "f32 mismatch vs reference"

    print("KERNEL_OK")
</pallas_src>

<mosaic_0001>
module attributes {stable_mosaic.version = 11 : i64} {
  func.func @_bilinear_decoder_kernel(%arg0: i32, %arg1: i32, %arg2: memref<64x32xf32, #tpu.memory_space<vmem>>, %arg3: memref<32x128xf32, #tpu.memory_space<vmem>>, %arg4: memref<64x128xbf16, #tpu.memory_space<vmem>>) attributes {dimension_semantics = [#tpu.dimension_semantics<parallel>, #tpu.dimension_semantics<parallel>], iteration_bounds = array<i64: 2, 1>, scalar_prefetch = 0 : i64, scratch_operands = 0 : i64, tpu.core_type = #tpu.core_type<tc>, window_params = [{transform_indices = @transform_0, window_bounds = array<i64: 64, 32>}, {transform_indices = @transform_1, window_bounds = array<i64: 32, 128>}, {transform_indices = @transform_2, window_bounds = array<i64: 64, 128>}]} {
    %c0 = arith.constant 0 : index
    %c0_0 = arith.constant 0 : index
    %0 = vector.load %arg2[%c0, %c0_0] : memref<64x32xf32, #tpu.memory_space<vmem>>, vector<64x32xf32>
    %c0_1 = arith.constant 0 : index
    %c0_2 = arith.constant 0 : index
    %1 = vector.load %arg3[%c0_1, %c0_2] : memref<32x128xf32, #tpu.memory_space<vmem>>, vector<32x128xf32>
    %cst = arith.constant dense<0.000000e+00> : vector<64x128xf32>
    %2 = tpu.matmul %0, %1, %cst {dimension_numbers = #tpu.dot_dimension_numbers<[1], [0], [0], [1], [0, 0, 1, 1], [], []>} : vector<64x32xf32>, vector<32x128xf32>, vector<64x128xf32> -> vector<64x128xf32>
    %cst_3 = arith.constant 5.000000e-01 : f32
    %3 = vector.broadcast %cst_3 : f32 to vector<64x128xf32>
    %4 = arith.mulf %3, %2 : vector<64x128xf32>
    %5 = math.tanh %4 : vector<64x128xf32>
    %cst_4 = arith.constant 5.000000e-01 : f32
    %6 = vector.broadcast %cst_4 : f32 to vector<64x128xf32>
    %7 = arith.mulf %6, %5 : vector<64x128xf32>
    %cst_5 = arith.constant 5.000000e-01 : f32
    %8 = vector.broadcast %cst_5 : f32 to vector<64x128xf32>
    %9 = arith.addf %7, %8 : vector<64x128xf32>
    %10 = arith.truncf %9 : vector<64x128xf32> to vector<64x128xbf16>
    %c0_6 = arith.constant 0 : index
    %c0_7 = arith.constant 0 : index
    %11 = vector.load %arg4[%c0_6, %c0_7] : memref<64x128xbf16, #tpu.memory_space<vmem>>, vector<64x128xbf16>
    tpu.vector_store %arg4[%c0_6, %c0_7], %10 {strides = array<i32>} : memref<64x128xbf16, #tpu.memory_space<vmem>>, vector<64x128xbf16>,
    return
  }
  func.func @transform_0(%arg0: i32, %arg1: i32) -> (i32, i32) {
    %c0_i32 = arith.constant 0 : i32
    %c0_i32_0 = arith.constant 0 : i32
    return %arg0, %c0_i32 : i32, i32
  }
  func.func @transform_1(%arg0: i32, %arg1: i32) -> (i32, i32) {
    %c0_i32 = arith.constant 0 : i32
    %c0_i32_0 = arith.constant 0 : i32
    return %c0_i32, %arg1 : i32, i32
  }
  func.func @transform_2(%arg0: i32, %arg1: i32) -> (i32, i32) {
    %c0_i32 = arith.constant 0 : i32
    return %arg0, %arg1 : i32, i32
  }
}

</mosaic_0001>

<bundles_post_ra>
// kernel: bilinear_decoder.1
= control target key start
LH: loop header
LB: loop body
LE: loop exit
PB: predicated region body
PF: predicated region fallthrough
CT: control target
= control target key end

     0   :  { %7 = vsyncpa [#allocation3], 0  ;;  %s907_s0 = inlined_call_operand.vmem [shape: f32[128,32], index: 0, kind: input, shape index: {}]   ;;  %s908_s1 = inlined_call_operand.vmem [shape: f32[32,128], index: 1, kind: input, shape index: {}]   ;;  %s909_s2 = inlined_call_operand.hbm [shape: bf16[128,128], index: 2, kind: output, shape index: {}]  }
   0x1   :  { %9 = vsyncpa [#allocation3 + $0x1], 0  ;;  %s769_s9 = smov 0   ;;  %s771_s10 = smov 0  }
   0x2   :  { %s773_s11 = smov 0   ;;  %s775_s12 = smov 0  }
   0x3   :  { %s777_s13 = smov 0   ;;  %s779_s14 = smov 0  }
   0x4 LB: > { %s492_s15 = sadd.s32 4294967295, %s749_s14   ;;  %s493_s16 = sadd.s32 4294967294, %s749_s14   ;;  %s749_s14 = sphi %s779_s14, %s15_s14   ;;  %s745_s13 = sphi %s777_s13, %s916_s13   ;;  %s741_s12 = sphi %s775_s12, %s915_s12   ;;  %s737_s11 = sphi %s773_s11, %s914_s11   ;;  %s733_s10 = sphi %s771_s10, %s913_s10   ;;  %s729_s9 = sphi %s769_s9, %s912_s9  }
   0x5   : > { %s27_s17 = sadd.s32 1, %s745_s13  ;;  %s88_s18 = sadd.s32 1, %s737_s11 }
   0x6   : > { %p29_p0 = scmp.ge.s32.totalorder %s27_s17, 2  ;;  %p98_p1 = scmp.ne.s32.totalorder %s737_s11, %s733_s10 }
   0x7   : > { %p99_p2 = scmp.eq.s32.totalorder %s492_s15, 1  ;;  %p104_p3 = scmp.ne.s32.totalorder %s733_s10, %s729_s9 }
   0x8   : > { %s918_s17 = smov (%p29_p0, %s27_s17), 0  ;;  %p105_p5 = scmp.eq.s32.totalorder %s493_s16, 1 }
   0x9   : > { %p809_p4 = por %p99_p2, %p98_p1  ;;  %s83_s20 = ssub.s32 %s745_s13, %s918_s17 }
   0xa   : > { %p497_p6 = scmp.ge.s32.totalorder %s749_s14, 1  ;;  %p86_p7 = scmp.eq.s32.totalorder %s83_s20, 0 }
   0xb   : > { %p816_p8 = por %p105_p5, %p104_p3  ;;  %p139_p9 = scmp.lt.s32.totalorder %s749_s14, 3 }
   0xc   : > { %s822_s22 = scalar_select %p86_p7, %s737_s11, %s88_s18  }
   0xd   : > { %p140_p10 = pnand %p497_p6, %p139_p9 }
   0xe   : > { %v184_v0 = vld [vmem:[%s908_s1] sm:$0xff] (!%p140_p10)  ;;  %v185_v1 = vld [vmem:[%s908_s1 + $0x8] sm:$0xff] (!%p140_p10)  ;;  %v186_v2 = vld [vmem:[%s908_s1 + $0x10] sm:$0xff] (!%p140_p10)  ;;  %s499_s29 = sshll.u32 (!%p140_p10), %s741_s12, 3  ;;  %vm188_vm0 = vcmask (!%p140_p10), 261120   ;;  %s162_s8 = sand.u32 (!%p140_p10), 1, %s733_s10  }
   0xf   : > { %143 = sbr.rel (%p140_p10) target bundleno = 280 (0x118), region = 28  ;;  %v586_v3 = vpack.c.bf16 (!%p140_p10), %v185_v1, %v184_v0  ;;  %v187_v4 = vld [vmem:[%s908_s1 + $0x18] sm:$0xff] (!%p140_p10)  ;;  %p166_p11 = scmp.lt.s32.totalorder (!%p140_p10), %s499_s29, 15 }
  0x10   : > { %v590_v5 = vpack.c.bf16 (!%p140_p10), %v187_v4, %v186_v2  ;;  %s498_s15 = sshll.u32 (!%p140_p10), %s162_s8, 5  ;;  %s530_s16 = sshll.u32 (!%p140_p10), %s741_s12, 9 }
  0x11   : > { %587 = vmatprep.subr.bf16.mxu0 (!%p140_p10), %v586_v3  ;;  %594 = vmatprep.subr.bf16.mxu1 (!%p140_p10), %v586_v3  ;;  %s164_s18 = scalar_lea.vmem (!%p140_p10), [#allocation2], %s498_s15  ;;  %s855_s25 = scalar_lea.hbm (!%p140_p10), %s909_s2, %s530_s16 }
  0x12   : > { %589 = vmatpush3.bf16.msra.mxu0 (!%p140_p10), %v586_v3  ;;  %596 = vmatpush3.bf16.msra.mxu1 (!%p140_p10), %v586_v3  ;;  %s405_s20 = sshll.u32 (!%p140_p10), %s164_s18, 4  ;;  %s861_s12 = scalar_lea.sflag (!%p140_p10), [#allocation3], %s162_s8  ;;  %s857_s20 = int_to_ptr.vmem [resolvable:$true] %s405_s20 }
  0x13   : > { %591 = vmatprep.subr.bf16.mxu0 (!%p140_p10), %v590_v5  ;;  %595 = vmatprep.subr.bf16.mxu1 (!%p140_p10), %v590_v5  ;;  %s671_s26 = scalar_lea.vmem (!%p140_p10), %s857_s20, 512  ;;  %s751_s27 = smov (!%p140_p10), [#allocation2]  }
  0x14   : > { %p672_p12 = scmp.ne.s32.totalorder (!%p140_p10), %s857_s20, %s671_s26  ;;  %s675_s28 = sshll.u32 (!%p140_p10), %s751_s27, 4  ;;  %s676_s28 = int_to_ptr.vmem [resolvable:$false] %s675_s28 }
  0x15   : > { %p678_p1 = scmp.lt.s32.totalorder (!%p140_p10), %s857_s20, %s676_s28 }
  0x16   : > { %s920_s29 = smov (!%p166_p11, %s499_s29), 15  ;;  %593 = vmatpush3.bf16.msra.mxu0 %v590_v5  ;;  %597 = vmatpush3.bf16.msra.mxu1 %v590_v5  ;;  %p673_p13 = pnand %p672_p12, %p809_p4 }
  0x17   : > { %s500_s4 = sshll.u32 %s920_s29, 3  ;;  %s677_s29 = scalar_lea.vmem %s676_s28, 1024 }
  0x18   : > { %s169_s7 = scalar_lea.vmem %s907_s0, %s500_s4  ;;  %p674_p0 = pneg %p673_p13 }
  0x19   : > { %v176_v6 = vld [vmem:[%s169_s7] sm:$0xff]  ;;  %v177_v8 = vld [vmem:[%s169_s7 + $0x8] sm:$0xff]  ;;  %v178_v10 = vld [vmem:[%s169_s7 + $0x10] sm:$0xff]  ;;  %p679_p2 = scmp.lt.s32.totalorder %s677_s29, %s671_s26 }
  0x1a   : > { %v180_v7 = vld [vmem:[%s169_s7 + $0x20] sm:$0xff]  ;;  %v181_v9 = vld [vmem:[%s169_s7 + $0x28] sm:$0xff]  ;;  %574 = vmatprep.mubr.msk.f32.mxu0 %vm188_vm0, %v176_v6  ;;  %v182_v11 = vld [vmem:[%s169_s7 + $0x30] sm:$0xff] }
  0x1b   : > { %580 = vmatprep.mubr.msk.f32.mxu1 %vm188_vm0, %v180_v7  ;;  %575 = vmatmul.mubr.msk.f32.vlgmr.msra.gmra.mrb[0].mxu0 %vm188_vm0, %v177_v8  ;;  %v179_v12 = vld [vmem:[%s169_s7 + $0x18] sm:$0xff]  ;;  %p680_p3 = por %p679_p2, %p678_p1 }
  0x1c   : > { %581 = vmatmul.mubr.msk.f32.vlgmr.msra.gmra.mrb[0].mxu1 %vm188_vm0, %v181_v9  ;;  %577 = vmatprep.mubr.msk.f32.mxu0 %vm188_vm0, %v178_v10  ;;  %v183_v13 = vld [vmem:[%s169_s7 + $0x38] sm:$0xff] }
  0x1d   : > { %583 = vmatprep.mubr.msk.f32.mxu1 %vm188_vm0, %v182_v11  ;;  %p681_p5 = pnand %p680_p3, %p674_p0 }
  0x1f   : > { %578 = vmatmul.mubr.msk.f32.gmra.mrb[2].mxu0 %vm188_vm0, %v179_v12 }
  0x20   : > { %584 = vmatmul.mubr.msk.f32.gmra.mrb[2].mxu1 %vm188_vm0, %v183_v13 }
  0xee   : > { %v576_v14 = vpop.f32.mrb[0].mxu0 }
  0xef   : > { %v582_v15 = vpop.f32.mrb[0].mxu1  ;;  %v319_v16 = vmul.f32 0.5, %v576_v14  ;;  %v279_v18 = vpop.f32.mrb[1].mxu0 }
  0xf0   : > { %v323_v17 = vmul.f32 0.5, %v582_v15  ;;  %v299_v19 = vpop.f32.mrb[1].mxu1  ;;  %v318_v20 = vmul.f32 0.5, %v279_v18 }
  0xf1   : > { %v322_v21 = vmul.f32 0.5, %v299_v19  ;;  %655 = vtanh.f32 %v319_v16 }
  0xf2   : > { %657 = vtanh.f32 %v323_v17  ;;  %v579_v22 = vpop.f32.mrb[2].mxu0 }
  0xf3   : > { %v585_v23 = vpop.f32.mrb[2].mxu1  ;;  %659 = vtanh.f32 %v318_v20  ;;  %v321_v24 = vmul.f32 0.5, %v579_v22  ;;  %v289_v26 = vpop.f32.mrb[3].mxu0 }
  0xf4   : > { %v325_v25 = vmul.f32 0.5, %v585_v23  ;;  %v309_v27 = vpop.f32.mrb[3].mxu1  ;;  %661 = vtanh.f32 %v322_v21  ;;  %v320_v28 = vmul.f32 0.5, %v289_v26 }
  0xf5   : > { %v324_v29 = vmul.f32 0.5, %v309_v27  ;;  %663 = vtanh.f32 %v321_v24 }
  0xf6   : > { %665 = vtanh.f32 %v325_v25 }
  0xf7   : > { %667 = vtanh.f32 %v320_v28 }
  0xf8   : > { %669 = vtanh.f32 %v324_v29 }
  0xfb   : > { %v656_v30 = vpop.eup %655 }
  0xfc   : > { %v658_v31 = vpop.eup %657  ;;  %v335_v32 = vmul.f32 0.5, %v656_v30 }
  0xfd   : > { %v660_v33 = vpop.eup %659  ;;  %v339_v34 = vmul.f32 0.5, %v658_v31 }
  0xfe   : > { %v662_v35 = vpop.eup %661  ;;  %v343_v36 = vadd.f32 0.5, %v335_v32  ;;  %v334_v37 = vmul.f32 0.5, %v660_v33 }
  0xff   : > { %v664_v38 = vpop.eup %663  ;;  %v347_v39 = vadd.f32 0.5, %v339_v34  ;;  %v338_v40 = vmul.f32 0.5, %v662_v35 }
 0x100   : > { %v666_v41 = vpop.eup %665  ;;  %v342_v42 = vadd.f32 0.5, %v334_v37  ;;  %v337_v43 = vmul.f32 0.5, %v664_v38 }
 0x101   : > { %v668_v44 = vpop.eup %667  ;;  %v346_v45 = vadd.f32 0.5, %v338_v40  ;;  %v341_v46 = vmul.f32 0.5, %v666_v41 }
 0x102   : > { %v670_v47 = vpop.eup %669  ;;  %v534_v48 = vpack.c.bf16 %v343_v36, %v342_v42  ;;  %v345_v49 = vadd.f32 0.5, %v337_v43  ;;  %v336_v50 = vmul.f32 0.5, %v668_v44 }
 0x103   : > { %v544_v51 = vpack.c.bf16 %v347_v39, %v346_v45  ;;  %v349_v52 = vadd.f32 0.5, %v341_v46  ;;  %v340_v53 = vmul.f32 0.5, %v670_v47 }
 0x104   : > { %535 = vst [vmem:[%s164_s18] sm:$0xff] %v534_v48   ;;  %v344_v54 = vadd.f32 0.5, %v336_v50 }
 0x105   : > { %552 = vst [vmem:[%s164_s18 + $0x10] sm:$0xff] %v544_v51   ;;  %v348_v55 = vadd.f32 0.5, %v340_v53 }
 0x106   : > { %v539_v56 = vpack.c.bf16 %v345_v49, %v344_v54 }
 0x107   : > { %v549_v57 = vpack.c.bf16 %v349_v52, %v348_v55 }
 0x108   : > { %551 = vst [vmem:[%s164_s18 + $0x8] sm:$0xff] %v539_v56  }
 0x109   : > { %553 = vst [vmem:[%s164_s18 + $0x18] sm:$0xff] %v549_v57  }
 0x10a   : > { %684 = shalt.err (!%p681_p5)
}
 0x10b   : > { %s685_s30 = scalar_lea.hbm %s855_s25, 512  ;;  %s689_s5 = scalar_lea.hbm %s909_s2, 1024 }
 0x10c   : > { %p686_p6 = scmp.ne.s32.totalorder %s855_s25, %s685_s30  ;;  %p690_p10 = scmp.lt.u32.totalorder %s855_s25, %s909_s2 }
 0x10d   : > { %p691_p11 = scmp.lt.u32.totalorder %s689_s5, %s685_s30  ;;  %p693_p13 = scmp.lt.u32.totalorder %s685_s30, %s855_s25 }
 0x10e   : > { %p687_p7 = pnand %p686_p6, %p809_p4 }
 0x10f   : > { %p692_p12 = por %p691_p11, %p690_p10 }
 0x110   : > { %p688_p9 = pneg %p687_p7 }
 0x111   : > { %p694_p0 = por %p693_p13, %p692_p12 }
 0x113   : > { %p695_p1 = pnand %p694_p0, %p688_p9 }
 0x115   : > { %698 = shalt.err (!%p695_p1)
}
 0x116   : > { %s752_s8 = smov 64   ;;  %s753_s15 = smov 4  }
 0x117   : > { %598 = dma.vmem_to_hbm [thread:$0]  (%p809_p4), %s857_s20, 512, %s855_s25, %s861_s12, %s752_s8, %s752_s8, %s753_s15  }
 0x118 PF: > { %p604_p2 = scmp.ge.s32.totalorder %s749_s14, 2  ;;  %s420_s16 = sand.u32 1, %s729_s9  }
 0x119   : > { %s421_s18 = scalar_lea.sflag [#allocation3], %s420_s16 }
 0x11a   : > { %p601_p3 = pnand %p604_p2, %p816_p8 }
 0x11c   : > { %724 = dma.done.wait (!%p601_p3), %s421_s18, 512  }
 0x11d   : > { %726 = vsyncadd (!%p601_p3), %s421_s18, 4294966784  ;;  %s15_s14 = sadd.s32 1, %s749_s14   ;;  %s912_s9 = smov %s733_s10 }
 0x11e   : > { %p12_p5 = scmp.ge.s32.totalorder %s15_s14, 4   ;;  %s913_s10 = smov %s737_s11 }
 0x11f   : > { %s914_s11 = smov %s822_s22  ;;  %s915_s12 = smov %s745_s13 }
 0x120   : > { %s916_s13 = smov %s918_s17  ;;  %14 = sbr.rel (!%p12_p5) target bundleno = 4 (0x4), region = 66 }
 0x127   :  { %426 = vsyncpa [#allocation3], 1 }
 0x128   :  { %428 = vsyncpa [#allocation3 + $0x1], 1 }

</bundles_post_ra>
